<compile_context>
chip_gen: v6e
topology: v6e:2x2x1
jax: 0.10.0
libtpu: 0.0.40
codegen_flags: <defaults>
</compile_context>

<pallas_src>
import jax
import jax.numpy as jnp
from jax.experimental import pallas as pl
from jax.experimental.pallas import tpu as pltpu


# ----------------------------------------------------------------------------
# helpers
# ----------------------------------------------------------------------------
def _round_up(x, m):
    return (x + m - 1) // m * m


def _cdiv(a, b):
    return -(-a // b)


def _pad2d(a, rows, cols):
    pr, pc = rows - a.shape[0], cols - a.shape[1]
    if pr == 0 and pc == 0:
        return a
    return jnp.pad(a, ((0, pr), (0, pc)))


def positional_embed(x, n_freq):
    """JAX port of Embedder (include_input=True, log-sampled sin/cos bands).

    Identity when n_freq < 0 (the DinoDecoder default).  Tiny elementwise glue,
    kept in plain JAX outside the kernel.
    """
    if n_freq < 0:
        return x
    outs = [x]
    for i in range(n_freq):           # log_sampling=True -> freqs = 2**i
        f = 2.0 ** i
        outs.append(jnp.sin(x * f))
        outs.append(jnp.cos(x * f))
    return jnp.concatenate(outs, axis=-1) if len(outs) > 1 else x


# ----------------------------------------------------------------------------
# fused decoder kernel
# ----------------------------------------------------------------------------
def _make_decoder_kernel(num_layers, skip_split):
    """skip_split[l] is None for normal layers; for a skip layer it is the row
    index where the (pre-transposed) weight splits into [h-rows | feat-rows]."""
    skip_split = tuple(skip_split)

    def kernel(x_ref, *refs):
        w_refs = refs[:num_layers]
        b_refs = refs[num_layers:2 * num_layers]
        o_ref = refs[2 * num_layers]

        wd = w_refs[0].dtype
        # x is streamed f32; cast to the stream/compute dtype per row tile here
        # (no wrapper-side astype copy in HBM).
        feat = x_ref[...].astype(wd)          # (tm, in_ch)
        h = feat
        for l in range(num_layers):
            k_h = skip_split[l]
            if k_h is None:
                # weights are pre-transposed to (in_pad, out_pad): contraction
                # dim leads -> no in-kernel weight relayout/transpose.
                y = jnp.dot(h, w_refs[l][...],
                            preferred_element_type=jnp.float32)
            else:
                # forward: h = concat([h, feat]) then Linear.  Implemented as
                # two MXU matmuls on the row-split weight (no in-kernel concat).
                y = jnp.dot(h, w_refs[l][0:k_h, :],
                            preferred_element_type=jnp.float32)
                y = y + jnp.dot(feat, w_refs[l][k_h:, :],
                                preferred_element_type=jnp.float32)
            y = y + b_refs[l][...]            # bias in f32, broadcasts over rows
            if l != num_layers - 1:
                # DenseLayer ReLU; downcast to the stream dtype fused in.
                h = jnp.maximum(y, 0.0).astype(wd)
            else:
                # last layer is a plain Linear; unpadded lane-width store.
                o_ref[...] = y.astype(o_ref.dtype)

    return kernel


# ----------------------------------------------------------------------------
# factory: prepare parameters once, return a forward callable
# ----------------------------------------------------------------------------
def build_dino_decoder(weights, biases, *, skips=(), n_freq=-1,
                       block_m=2048, min_tm=256,
                       param_dtype=jnp.bfloat16, interpret=False):
    """Build a fused Pallas forward for DinoDecoder.

    weights: list of (out_dim_l, in_dim_l) arrays (PyTorch nn.Linear layout)
    biases:  list of (out_dim_l,) arrays
    skips:   layer indices l that see concat([h, feat]) as input
    n_freq:  positional-encoding bands (-1 = identity, the module default)
    param_dtype: stream dtype for x / W / activations (bf16 default; MXU
                 accumulation, bias and ReLU remain f32)

    Parameter padding / transpose / cast happen ONCE here (hoisted out of the
    per-call path); the returned `forward(feat)` is jit-able.
    """
    skips = tuple(int(s) for s in skips)
    weights = [jnp.asarray(w, jnp.float32) for w in weights]
    biases = [jnp.asarray(b, jnp.float32) for b in biases]
    num_layers = len(weights)
    assert len(biases) == num_layers and num_layers >= 1

    out_dims = [int(w.shape[0]) for w in weights]
    # Hidden widths padded to 128 lanes (intermediates never touch HBM, padding
    # keeps every K aligned); the FINAL layer keeps its logical width so the
    # output HBM write is not 8x-padded.
    pad_out = [_round_up(d, 128) for d in out_dims[:-1]] + [out_dims[-1]]

    # embedded input width, inferred from the first layer
    in_ch = int(weights[0].shape[1])
    if 0 in skips:
        assert in_ch % 2 == 0, "skip at layer 0 implies doubled in_dim"
        in_ch //= 2

    # ---- one-time parameter prep: transpose -> zero-pad -> cast -------------
    # Zero-padded weight rows/cols and zero-padded biases keep padded channels
    # exactly 0 through every Linear+ReLU, so numerics are unchanged.
    w_prep, b_prep, skip_split = [], [], []
    for l in range(num_layers):
        w, b = weights[l], biases[l]
        prev_logical = in_ch if l == 0 else out_dims[l - 1]
        prev_padded = in_ch if l == 0 else pad_out[l - 1]
        wt = w.T                                      # (in_dim, out_dim)
        if l in skips:
            assert w.shape[1] == prev_logical + in_ch, "skip-layer in_dim mismatch"
            wt_h = _pad2d(wt[:prev_logical, :], prev_padded, pad_out[l])
            wt_f = _pad2d(wt[prev_logical:, :], in_ch, pad_out[l])
            wt_p = jnp.concatenate([wt_h, wt_f], axis=0)
            skip_split.append(prev_padded)            # tile-aligned split row
        else:
            assert w.shape[1] == prev_logical, "layer in_dim mismatch"
            wt_p = _pad2d(wt, prev_padded, pad_out[l])
            skip_split.append(None)
        w_prep.append(wt_p.astype(param_dtype))
        bp = b if pad_out[l] == out_dims[l] else jnp.pad(b, (0, pad_out[l] - out_dims[l]))
        b_prep.append(bp.reshape(1, pad_out[l]).astype(jnp.float32))

    kernel = _make_decoder_kernel(num_layers, skip_split)
    out_dim_last = out_dims[-1]

    def forward(feat):
        # 1) embed + flatten leading dims (cheap elementwise / reshape glue)
        x = positional_embed(feat, n_freq)
        assert x.shape[-1] == in_ch, "embedded feature width mismatch"
        lead_shape = x.shape[:-1]
        x2 = x.reshape(-1, in_ch)
        batch = x2.shape[0]

        # 2) row tiling: balanced tiles (caps row-padding waste), and >=2
        #    (even) grid steps when there is enough work so v7x's two
        #    TensorCores both engage under dimension_semantics=("parallel",).
        n_tiles = max(1, _cdiv(batch, block_m))
        if batch >= 2 * min_tm:
            if n_tiles == 1:
                n_tiles = 2
            elif n_tiles % 2 == 1 and batch >= (n_tiles + 1) * min_tm:
                n_tiles += 1
        tm = _round_up(_cdiv(batch, n_tiles), 8)
        padded_batch = _round_up(batch, tm)
        x_pad = x2 if padded_batch == batch else jnp.pad(
            x2, ((0, padded_batch - batch), (0, 0)))
        grid = (padded_batch // tm,)

        # 3) specs: x/out tiled over rows; weights/biases use constant block
        #    indices -> DMA'd once, VMEM-resident across all grid steps.
        in_specs = [pl.BlockSpec((tm, in_ch), lambda i: (i, 0))]
        for wp in w_prep:
            in_specs.append(pl.BlockSpec(wp.shape, lambda i: (0, 0)))
        for bp in b_prep:
            in_specs.append(pl.BlockSpec(bp.shape, lambda i: (0, 0)))
        out_specs = pl.BlockSpec((tm, out_dim_last), lambda i: (i, 0))

        flops = 2 * padded_batch * sum(int(p.shape[0]) * int(p.shape[1]) for p in w_prep)
        bytes_accessed = int(
            x_pad.size * x_pad.dtype.itemsize
            + sum(p.size * p.dtype.itemsize for p in w_prep)
            + sum(p.size * p.dtype.itemsize for p in b_prep)
            + padded_batch * out_dim_last * jnp.dtype(feat.dtype).itemsize)

        out_pad_rows = pl.pallas_call(
            kernel,
            out_shape=jax.ShapeDtypeStruct((padded_batch, out_dim_last), feat.dtype),
            grid=grid,
            in_specs=in_specs,
            out_specs=out_specs,
            compiler_params=pltpu.CompilerParams(
                dimension_semantics=("parallel",),   # v7x: split rows across 2 TCs
                vmem_limit_bytes=48 * 1024 * 1024),  # sized against v7x's 64 MiB
            cost_estimate=pl.CostEstimate(
                flops=flops, transcendentals=0, bytes_accessed=bytes_accessed),
            interpret=interpret,
        )(x_pad, *w_prep, *b_prep)

        out = out_pad_rows[:batch]                    # strip row padding only
        return out.reshape(lead_shape + (out_dim_last,))

    return forward


def dino_decoder_forward(feat, weights, biases, **kwargs):
    """Convenience one-shot wrapper (prep is re-done per call; prefer the factory)."""
    return build_dino_decoder(weights, biases, **kwargs)(feat)


# ----------------------------------------------------------------------------
# plain-JAX reference (mirrors the PyTorch forward)
# ----------------------------------------------------------------------------
def dino_decoder_reference(feat, weights, biases, *, skips=(), n_freq=-1):
    x = positional_embed(feat, n_freq)
    h = x
    L = len(weights)
    for l in range(L):
        if l in skips:
            h = jnp.concatenate([h, x], axis=-1)
        h = jnp.dot(h, weights[l].T, precision=jax.lax.Precision.HIGHEST) + biases[l]
        if l != L - 1:
            h = jnp.maximum(h, 0.0)
    return h


def _init_linear(key, in_dim, out_dim):
    kw, kb = jax.random.split(key)
    bound = 1.0 / (in_dim ** 0.5)       # nn.Linear default uniform init
    w = jax.random.uniform(kw, (out_dim, in_dim), minval=-bound, maxval=bound,
                           dtype=jnp.float32)
    b = jax.random.uniform(kb, (out_dim,), minval=-bound, maxval=bound,
                           dtype=jnp.float32)
    return w, b


def _build_params(key, in_ch, widths, skips):
    weights, biases = [], []
    prev = in_ch
    for l, out_dim in enumerate(widths):
        key, sub = jax.random.split(key)
        in_dim = prev + (in_ch if l in skips else 0)
        w, b = _init_linear(sub, in_dim, out_dim)
        weights.append(w)
        biases.append(b)
        prev = out_dim
    return weights, biases


# TODO(synk): weight_norm=True reparameterization (module default is False) is
# not implemented; weights are consumed as plain dense matrices.

if __name__ == "__main__":
    key = jax.random.PRNGKey(0)

    # --- Config A: DinoDecoder defaults (identity embedder, no skips), small
    # shapes, f32 streaming (tight tolerance check of the math path).
    input_feat_dim = 16
    widths_a = [64, 64, 64, 64, 16]
    batch_a = 8
    key, kx_a, kp_a = jax.random.split(key, 3)
    feat_a = jax.random.normal(kx_a, (batch_a, input_feat_dim), dtype=jnp.float32)
    w_a, b_a = _build_params(kp_a, input_feat_dim, widths_a, skips=())

    fwd_a = jax.jit(build_dino_decoder(w_a, b_a, skips=(), n_freq=-1,
                                       param_dtype=jnp.float32))
    out_a = jax.block_until_ready(fwd_a(feat_a))
    ref_a = dino_decoder_reference(feat_a, w_a, b_a, skips=(), n_freq=-1)
    assert out_a.shape == (batch_a, widths_a[-1])
    assert jnp.allclose(out_a, ref_a, atol=2e-3, rtol=2e-3), \
        float(jnp.max(jnp.abs(out_a - ref_a)))

    # --- Config B: positional embedding + a skip connection + ragged batch,
    # f32 streaming (exercises row padding, split-weight skip path, narrow out).
    n_freq_b = 2
    in_ch_b = input_feat_dim * (1 + 2 * n_freq_b)
    widths_b = [48, 48, 24]
    skips_b = (2,)
    batch_b = 37
    key, kx_b, kp_b = jax.random.split(key, 3)
    feat_b = jax.random.normal(kx_b, (batch_b, input_feat_dim), dtype=jnp.float32)
    w_b, b_b = _build_params(kp_b, in_ch_b, widths_b, skips=skips_b)

    fwd_b = jax.jit(build_dino_decoder(w_b, b_b, skips=skips_b, n_freq=n_freq_b,
                                       param_dtype=jnp.float32))
    out_b = jax.block_until_ready(fwd_b(feat_b))
    ref_b = dino_decoder_reference(feat_b, w_b, b_b, skips=skips_b, n_freq=n_freq_b)
    assert out_b.shape == (batch_b, widths_b[-1])
    assert jnp.allclose(out_b, ref_b, atol=2e-3, rtol=2e-3), \
        float(jnp.max(jnp.abs(out_b - ref_b)))

    # --- Config C: default bf16 streaming + multi-tile grid (exercises the
    # balanced row tiling and the parallel grid axis; loose bf16 tolerance).
    widths_c = [128, 128, 16]
    batch_c = 600
    key, kx_c, kp_c = jax.random.split(key, 3)
    feat_c = jax.random.normal(kx_c, (batch_c, input_feat_dim), dtype=jnp.float32)
    w_c, b_c = _build_params(kp_c, input_feat_dim, widths_c, skips=())

    fwd_c = jax.jit(build_dino_decoder(w_c, b_c, skips=(), n_freq=-1,
                                       block_m=256))          # bf16 default
    out_c = jax.block_until_ready(fwd_c(feat_c))
    ref_c = dino_decoder_reference(feat_c, w_c, b_c, skips=(), n_freq=-1)
    assert out_c.shape == (batch_c, widths_c[-1])
    assert jnp.allclose(out_c, ref_c, atol=5e-2, rtol=5e-2), \
        float(jnp.max(jnp.abs(out_c - ref_c)))

    print("KERNEL_OK")
</pallas_src>

<mosaic_0001>
module attributes {stable_mosaic.version = 11 : i64} {
  func.func @kernel(%arg0: i32, %arg1: memref<8x16xf32, #tpu.memory_space<vmem>>, %arg2: memref<16x128xf32, #tpu.memory_space<vmem>>, %arg3: memref<128x128xf32, #tpu.memory_space<vmem>>, %arg4: memref<128x128xf32, #tpu.memory_space<vmem>>, %arg5: memref<128x128xf32, #tpu.memory_space<vmem>>, %arg6: memref<128x16xf32, #tpu.memory_space<vmem>>, %arg7: memref<1x128xf32, #tpu.memory_space<vmem>>, %arg8: memref<1x128xf32, #tpu.memory_space<vmem>>, %arg9: memref<1x128xf32, #tpu.memory_space<vmem>>, %arg10: memref<1x128xf32, #tpu.memory_space<vmem>>, %arg11: memref<1x16xf32, #tpu.memory_space<vmem>>, %arg12: memref<8x16xf32, #tpu.memory_space<vmem>>) attributes {dimension_semantics = [#tpu.dimension_semantics<parallel>], iteration_bounds = array<i64: 1>, scalar_prefetch = 0 : i64, scratch_operands = 0 : i64, tpu.core_type = #tpu.core_type<tc>, window_params = [{transform_indices = @transform_0, window_bounds = array<i64: 8, 16>}, {pipeline_mode = #tpu.pipeline_mode<synchronous>, transform_indices = @transform_1, window_bounds = array<i64: 16, 128>}, {pipeline_mode = #tpu.pipeline_mode<synchronous>, transform_indices = @transform_2, window_bounds = array<i64: 128, 128>}, {pipeline_mode = #tpu.pipeline_mode<synchronous>, transform_indices = @transform_3, window_bounds = array<i64: 128, 128>}, {pipeline_mode = #tpu.pipeline_mode<synchronous>, transform_indices = @transform_4, window_bounds = array<i64: 128, 128>}, {pipeline_mode = #tpu.pipeline_mode<synchronous>, transform_indices = @transform_5, window_bounds = array<i64: 128, 16>}, {pipeline_mode = #tpu.pipeline_mode<synchronous>, transform_indices = @transform_6, window_bounds = array<i64: 1, 128>}, {pipeline_mode = #tpu.pipeline_mode<synchronous>, transform_indices = @transform_7, window_bounds = array<i64: 1, 128>}, {pipeline_mode = #tpu.pipeline_mode<synchronous>, transform_indices = @transform_8, window_bounds = array<i64: 1, 128>}, {pipeline_mode = #tpu.pipeline_mode<synchronous>, transform_indices = @transform_9, window_bounds = array<i64: 1, 128>}, {pipeline_mode = #tpu.pipeline_mode<synchronous>, transform_indices = @transform_10, window_bounds = array<i64: 1, 16>}, {transform_indices = @transform_11, window_bounds = array<i64: 8, 16>}]} {
    %c0 = arith.constant 0 : index
    %c0_0 = arith.constant 0 : index
    %0 = vector.load %arg1[%c0, %c0_0] : memref<8x16xf32, #tpu.memory_space<vmem>>, vector<8x16xf32>
    %c0_1 = arith.constant 0 : index
    %c0_2 = arith.constant 0 : index
    %1 = vector.load %arg2[%c0_1, %c0_2] : memref<16x128xf32, #tpu.memory_space<vmem>>, vector<16x128xf32>
    %cst = arith.constant dense<0.000000e+00> : vector<8x128xf32>
    %2 = tpu.matmul %0, %1, %cst {dimension_numbers = #tpu.dot_dimension_numbers<[1], [0], [0], [1], [0, 0, 1, 1], [], []>} : vector<8x16xf32>, vector<16x128xf32>, vector<8x128xf32> -> vector<8x128xf32>
    %c0_3 = arith.constant 0 : index
    %c0_4 = arith.constant 0 : index
    %3 = vector.load %arg7[%c0_3, %c0_4] : memref<1x128xf32, #tpu.memory_space<vmem>>, vector<1x128xf32>
    %4 = vector.broadcast %3 : vector<1x128xf32> to vector<8x128xf32>
    %5 = arith.addf %2, %4 : vector<8x128xf32>
    %cst_5 = arith.constant 0.000000e+00 : f32
    %6 = vector.broadcast %cst_5 : f32 to vector<8x128xf32>
    %7 = arith.maximumf %5, %6 : vector<8x128xf32>
    %c0_6 = arith.constant 0 : index
    %c0_7 = arith.constant 0 : index
    %8 = vector.load %arg3[%c0_6, %c0_7] : memref<128x128xf32, #tpu.memory_space<vmem>>, vector<128x128xf32>
    %cst_8 = arith.constant dense<0.000000e+00> : vector<8x128xf32>
    %9 = tpu.matmul %7, %8, %cst_8 {dimension_numbers = #tpu.dot_dimension_numbers<[1], [0], [0], [1], [0, 0, 1, 1], [], []>} : vector<8x128xf32>, vector<128x128xf32>, vector<8x128xf32> -> vector<8x128xf32>
    %c0_9 = arith.constant 0 : index
    %c0_10 = arith.constant 0 : index
    %10 = vector.load %arg8[%c0_9, %c0_10] : memref<1x128xf32, #tpu.memory_space<vmem>>, vector<1x128xf32>
    %11 = vector.broadcast %10 : vector<1x128xf32> to vector<8x128xf32>
    %12 = arith.addf %9, %11 : vector<8x128xf32>
    %cst_11 = arith.constant 0.000000e+00 : f32
    %13 = vector.broadcast %cst_11 : f32 to vector<8x128xf32>
    %14 = arith.maximumf %12, %13 : vector<8x128xf32>
    %c0_12 = arith.constant 0 : index
    %c0_13 = arith.constant 0 : index
    %15 = vector.load %arg4[%c0_12, %c0_13] : memref<128x128xf32, #tpu.memory_space<vmem>>, vector<128x128xf32>
    %cst_14 = arith.constant dense<0.000000e+00> : vector<8x128xf32>
    %16 = tpu.matmul %14, %15, %cst_14 {dimension_numbers = #tpu.dot_dimension_numbers<[1], [0], [0], [1], [0, 0, 1, 1], [], []>} : vector<8x128xf32>, vector<128x128xf32>, vector<8x128xf32> -> vector<8x128xf32>
    %c0_15 = arith.constant 0 : index
    %c0_16 = arith.constant 0 : index
    %17 = vector.load %arg9[%c0_15, %c0_16] : memref<1x128xf32, #tpu.memory_space<vmem>>, vector<1x128xf32>
    %18 = vector.broadcast %17 : vector<1x128xf32> to vector<8x128xf32>
    %19 = arith.addf %16, %18 : vector<8x128xf32>
    %cst_17 = arith.constant 0.000000e+00 : f32
    %20 = vector.broadcast %cst_17 : f32 to vector<8x128xf32>
    %21 = arith.maximumf %19, %20 : vector<8x128xf32>
    %c0_18 = arith.constant 0 : index
    %c0_19 = arith.constant 0 : index
    %22 = vector.load %arg5[%c0_18, %c0_19] : memref<128x128xf32, #tpu.memory_space<vmem>>, vector<128x128xf32>
    %cst_20 = arith.constant dense<0.000000e+00> : vector<8x128xf32>
    %23 = tpu.matmul %21, %22, %cst_20 {dimension_numbers = #tpu.dot_dimension_numbers<[1], [0], [0], [1], [0, 0, 1, 1], [], []>} : vector<8x128xf32>, vector<128x128xf32>, vector<8x128xf32> -> vector<8x128xf32>
    %c0_21 = arith.constant 0 : index
    %c0_22 = arith.constant 0 : index
    %24 = vector.load %arg10[%c0_21, %c0_22] : memref<1x128xf32, #tpu.memory_space<vmem>>, vector<1x128xf32>
    %25 = vector.broadcast %24 : vector<1x128xf32> to vector<8x128xf32>
    %26 = arith.addf %23, %25 : vector<8x128xf32>
    %cst_23 = arith.constant 0.000000e+00 : f32
    %27 = vector.broadcast %cst_23 : f32 to vector<8x128xf32>
    %28 = arith.maximumf %26, %27 : vector<8x128xf32>
    %c0_24 = arith.constant 0 : index
    %c0_25 = arith.constant 0 : index
    %29 = vector.load %arg6[%c0_24, %c0_25] : memref<128x16xf32, #tpu.memory_space<vmem>>, vector<128x16xf32>
    %cst_26 = arith.constant dense<0.000000e+00> : vector<8x16xf32>
    %30 = tpu.matmul %28, %29, %cst_26 {dimension_numbers = #tpu.dot_dimension_numbers<[1], [0], [0], [1], [0, 0, 1, 1], [], []>} : vector<8x128xf32>, vector<128x16xf32>, vector<8x16xf32> -> vector<8x16xf32>
    %c0_27 = arith.constant 0 : index
    %c0_28 = arith.constant 0 : index
    %31 = vector.load %arg11[%c0_27, %c0_28] : memref<1x16xf32, #tpu.memory_space<vmem>>, vector<1x16xf32>
    %32 = vector.broadcast %31 : vector<1x16xf32> to vector<8x16xf32>
    %33 = arith.addf %30, %32 : vector<8x16xf32>
    %c0_29 = arith.constant 0 : index
    %c0_30 = arith.constant 0 : index
    %34 = vector.load %arg12[%c0_29, %c0_30] : memref<8x16xf32, #tpu.memory_space<vmem>>, vector<8x16xf32>
    tpu.vector_store %arg12[%c0_29, %c0_30], %33 {strides = array<i32>} : memref<8x16xf32, #tpu.memory_space<vmem>>, vector<8x16xf32>,
    return
  }
  func.func @transform_0(%arg0: i32) -> (i32, i32) {
    %c0_i32 = arith.constant 0 : i32
    %c0_i32_0 = arith.constant 0 : i32
    return %arg0, %c0_i32 : i32, i32
  }
  func.func @transform_1(%arg0: i32) -> (i32, i32) {
    %c0_i32 = arith.constant 0 : i32
    %c0_i32_0 = arith.constant 0 : i32
    %c0_i32_1 = arith.constant 0 : i32
    return %c0_i32, %c0_i32_0 : i32, i32
  }
  func.func @transform_2(%arg0: i32) -> (i32, i32) {
    %c0_i32 = arith.constant 0 : i32
    %c0_i32_0 = arith.constant 0 : i32
    %c0_i32_1 = arith.constant 0 : i32
    return %c0_i32, %c0_i32_0 : i32, i32
  }
  func.func @transform_3(%arg0: i32) -> (i32, i32) {
    %c0_i32 = arith.constant 0 : i32
    %c0_i32_0 = arith.constant 0 : i32
    %c0_i32_1 = arith.constant 0 : i32
    return %c0_i32, %c0_i32_0 : i32, i32
  }
  func.func @transform_4(%arg0: i32) -> (i32, i32) {
    %c0_i32 = arith.constant 0 : i32
    %c0_i32_0 = arith.constant 0 : i32
    %c0_i32_1 = arith.constant 0 : i32
    return %c0_i32, %c0_i32_0 : i32, i32
  }
  func.func @transform_5(%arg0: i32) -> (i32, i32) {
    %c0_i32 = arith.constant 0 : i32
    %c0_i32_0 = arith.constant 0 : i32
    %c0_i32_1 = arith.constant 0 : i32
    return %c0_i32, %c0_i32_0 : i32, i32
  }
  func.func @transform_6(%arg0: i32) -> (i32, i32) {
    %c0_i32 = arith.constant 0 : i32
    %c0_i32_0 = arith.constant 0 : i32
    %c0_i32_1 = arith.constant 0 : i32
    return %c0_i32, %c0_i32_0 : i32, i32
  }
  func.func @transform_7(%arg0: i32) -> (i32, i32) {
    %c0_i32 = arith.constant 0 : i32
    %c0_i32_0 = arith.constant 0 : i32
    %c0_i32_1 = arith.constant 0 : i32
    return %c0_i32, %c0_i32_0 : i32, i32
  }
  func.func @transform_8(%arg0: i32) -> (i32, i32) {
    %c0_i32 = arith.constant 0 : i32
    %c0_i32_0 = arith.constant 0 : i32
    %c0_i32_1 = arith.constant 0 : i32
    return %c0_i32, %c0_i32_0 : i32, i32
  }
  func.func @transform_9(%arg0: i32) -> (i32, i32) {
    %c0_i32 = arith.constant 0 : i32
    %c0_i32_0 = arith.constant 0 : i32
    %c0_i32_1 = arith.constant 0 : i32
    return %c0_i32, %c0_i32_0 : i32, i32
  }
  func.func @transform_10(%arg0: i32) -> (i32, i32) {
    %c0_i32 = arith.constant 0 : i32
    %c0_i32_0 = arith.constant 0 : i32
    %c0_i32_1 = arith.constant 0 : i32
    return %c0_i32, %c0_i32_0 : i32, i32
  }
  func.func @transform_11(%arg0: i32) -> (i32, i32) {
    %c0_i32 = arith.constant 0 : i32
    %c0_i32_0 = arith.constant 0 : i32
    return %arg0, %c0_i32 : i32, i32
  }
}

</mosaic_0001>

<bundles_post_ra>
// kernel: forward.1
= control target key start
LH: loop header
LB: loop body
LE: loop exit
PB: predicated region body
PF: predicated region fallthrough
CT: control target
= control target key end

     0   :  { %16 = vsyncpa [#allocation3], 0  ;;  %s1183_s0 = inlined_call_operand.hbm [shape: f32[8,16], index: 0, kind: input, shape index: {}]   ;;  %s1184_s1 = inlined_call_operand.hbm [shape: f32[16,128], index: 1, kind: input, shape index: {}]   ;;  %s1185_s2 = inlined_call_operand.hbm [shape: f32[128,128], index: 2, kind: input, shape index: {}]   ;;  %s1186_s3 = inlined_call_operand.hbm [shape: f32[128,128], index: 3, kind: input, shape index: {}]   ;;  %s1187_s4 = inlined_call_operand.hbm [shape: f32[128,128], index: 4, kind: input, shape index: {}]   ;;  %s1188_s5 = inlined_call_operand.hbm [shape: f32[128,16], index: 5, kind: input, shape index: {}]   ;;  %s1189_s6 = inlined_call_operand.vmem [shape: f32[1,128], index: 6, kind: input, shape index: {}]   ;;  %s1190_s7 = inlined_call_operand.vmem [shape: f32[1,128], index: 7, kind: input, shape index: {}]   ;;  %s1191_s8 = inlined_call_operand.vmem [shape: f32[1,128], index: 8, kind: input, shape index: {}]   ;;  %s1192_s9 = inlined_call_operand.vmem [shape: f32[1,128], index: 9, kind: input, shape index: {}]   ;;  %s1193_s10 = inlined_call_operand.vmem [shape: f32[1,16], index: 10, kind: input, shape index: {}]   ;;  %s1194_s11 = inlined_call_operand.hbm [shape: f32[8,16], index: 11, kind: output, shape index: {}]  }
   0x1   :  { %17 = vsyncpa [#allocation6], 0 }
   0x2   :  { %18 = vsyncpa [#allocation9], 0 }
   0x3   :  { %19 = vsyncpa [#allocation12], 0 }
   0x4   :  { %20 = vsyncpa [#allocation4], 0  ;;  %s983_s17 = smov [#allocation5]  }
   0x5   :  { %s36_s18 = sshll.u32 %s983_s17, 4  ;;  %s37_s18 = int_to_ptr.vmem [resolvable:$true] %s36_s18 }
   0x6   :  { %s841_s19 = scalar_lea.vmem %s37_s18, 256  ;;  %p846_p1 = scmp.lt.s32.totalorder %s37_s18, %s37_s18 }
   0x7   :  { %p842_p0 = scmp.ne.s32.totalorder %s37_s18, %s841_s19  ;;  %p847_p2 = scmp.lt.s32.totalorder %s841_s19, %s841_s19 }
   0x9   :  { %p848_p3 = por %p847_p2, %p846_p1 }
   0xb   :  { %p849_p4 = pnand %p848_p3, %p842_p0 }
   0xd   :  { %852 = shalt.err (!%p849_p4)
}
   0xe   :  { %s984_s20 = smov 128   ;;  %s985_s21 = smov 8  }
   0xf   :  { %42 = dma.hbm_to_vmem [thread:$0]  %s1184_s1, 256, %s37_s18, [#allocation6], %s984_s20, %s984_s20, %s985_s21  }
  0x10   :  { %s986_s24 = smov [#allocation8]   ;;  %s987_s26 = smov [#allocation2]  }
  0x11   :  { %s60_s25 = sshll.u32 %s986_s24, 4  ;;  %s27_s27 = sshll.u32 %s987_s26, 4  ;;  %s61_s25 = int_to_ptr.vmem [resolvable:$true] %s60_s25  ;;  %s28_s27 = int_to_ptr.vmem [resolvable:$true] %s27_s27 }
  0x12   :  { %s861_s28 = scalar_lea.vmem %s61_s25, 2048  ;;  %p866_p6 = scmp.lt.s32.totalorder %s61_s25, %s61_s25 }
  0x13   :  { %p862_p5 = scmp.ne.s32.totalorder %s61_s25, %s861_s28  ;;  %p867_p7 = scmp.lt.s32.totalorder %s861_s28, %s861_s28 }
  0x15   :  { %p868_p8 = por %p867_p7, %p866_p6 }
  0x17   :  { %p869_p9 = pnand %p868_p8, %p862_p5 }
  0x19   :  { %872 = shalt.err (!%p869_p9)
}
  0x1a   :  { %66 = dma.hbm_to_vmem [thread:$0]  %s1186_s3, 2048, %s61_s25, [#allocation9], %s984_s20, %s984_s20, %s985_s21  }
  0x1b   :  { %s881_s1 = scalar_lea.vmem %s28_s27, 128  ;;  %p886_p11 = scmp.lt.s32.totalorder %s28_s27, %s28_s27 }
  0x1c   :  { %p882_p10 = scmp.ne.s32.totalorder %s28_s27, %s881_s1  ;;  %p887_p12 = scmp.lt.s32.totalorder %s881_s1, %s881_s1 }
  0x1e   :  { %p888_p13 = por %p887_p12, %p886_p11 }
  0x20   :  { %p889_p0 = pnand %p888_p13, %p882_p10 }
  0x22   :  { %892 = shalt.err (!%p889_p0)
}
  0x23   :  { %30 = dma.hbm_to_vmem [thread:$0]  %s1183_s0, 128, %s28_s27, [#allocation3]  }
  0x24   :  { %s988_s14 = smov [#allocation7]   ;;  %s989_s16 = smov [#allocation10]  }
  0x25   :  { %s48_s15 = sshll.u32 %s988_s14, 4  ;;  %s72_s17 = sshll.u32 %s989_s16, 4  ;;  %s49_s15 = int_to_ptr.vmem [resolvable:$true] %s48_s15  ;;  %s73_s17 = int_to_ptr.vmem [resolvable:$true] %s72_s17 }
  0x26   :  { %s901_s18 = scalar_lea.vmem %s49_s15, 2048  ;;  %p906_p2 = scmp.lt.s32.totalorder %s49_s15, %s49_s15 }
  0x27   :  { %p902_p1 = scmp.ne.s32.totalorder %s49_s15, %s901_s18  ;;  %p907_p3 = scmp.lt.s32.totalorder %s901_s18, %s901_s18 }
  0x29   :  { %p908_p4 = por %p907_p3, %p906_p2 }
  0x2b   :  { %p909_p5 = pnand %p908_p4, %p902_p1 }
  0x2d   :  { %912 = shalt.err (!%p909_p5)
}
  0x2e   :  { %54 = dma.hbm_to_vmem [thread:$0]  %s1185_s2, 2048, %s49_s15, [#allocation6], %s984_s20, %s984_s20, %s985_s21  }
  0x2f   :  { %s921_s0 = scalar_lea.vmem %s73_s17, 2048  ;;  %p926_p7 = scmp.lt.s32.totalorder %s73_s17, %s73_s17 }
  0x30   :  { %p922_p6 = scmp.ne.s32.totalorder %s73_s17, %s921_s0  ;;  %p927_p8 = scmp.lt.s32.totalorder %s921_s0, %s921_s0 }
  0x32   :  { %p928_p9 = por %p927_p8, %p926_p7 }
  0x34   :  { %p929_p10 = pnand %p928_p9, %p922_p6 }
  0x36   :  { %932 = shalt.err (!%p929_p10)
}
  0x37   :  { %78 = dma.hbm_to_vmem [thread:$0]  %s1187_s4, 2048, %s73_s17, [#allocation9], %s984_s20, %s984_s20, %s985_s21  }
  0x38   :  { %s990_s24 = smov [#allocation11]  }
  0x39   :  { %s84_s25 = sshll.u32 %s990_s24, 4  ;;  %s85_s25 = int_to_ptr.vmem [resolvable:$true] %s84_s25 }
  0x3a   :  { %s941_s26 = scalar_lea.vmem %s85_s25, 2048  ;;  %p946_p12 = scmp.lt.s32.totalorder %s85_s25, %s85_s25 }
  0x3b   :  { %p942_p11 = scmp.ne.s32.totalorder %s85_s25, %s941_s26  ;;  %p947_p13 = scmp.lt.s32.totalorder %s941_s26, %s941_s26 }
  0x3d   :  { %p948_p0 = por %p947_p13, %p946_p12 }
  0x3f   :  { %p949_p1 = pnand %p948_p0, %p942_p11 }
  0x41   :  { %952 = shalt.err (!%p949_p1)
}
  0x42   :  { %90 = dma.hbm_to_vmem [thread:$0]  %s1188_s5, 2048, %s85_s25, [#allocation12], %s984_s20, %s984_s20, %s985_s21  }
  0x43   :  { %973 = dma.done.wait [#allocation3], 128  }
  0x44   :  { %974 = vsyncadd [#allocation3], 4294967168 }
  0x45   :  { %975 = dma.done.wait [#allocation6], 2304  }
  0x46   :  { %976 = vsyncadd [#allocation6], 4294964992 }
  0x47   :  { %977 = dma.done.wait [#allocation9], 4096  }
  0x48   :  { %978 = vsyncadd [#allocation9], 4294963200 }
  0x49   :  { %979 = dma.done.wait [#allocation12], 2048  }
  0x4a   :  { %980 = vsyncadd [#allocation12], 4294965248  ;;  %v991_v0 = vmov 0.0   ;;  %vm992_vm0 = vmmov 0   ;;  %v121_v1 = vld [vmem:[#allocation5 + $0x8] sm:$0xff]  ;;  %v120_v2 = vld [vmem:[#allocation5] sm:$0xff] }
  0x4b   :  { %675 = vmatprep.subr.mxu0 %v991_v0  ;;  %679 = vmatprep.mubr.msk.f32.mxu0 %vm992_vm0, %v991_v0  ;;  %v119_v3 = vld [vmem:[#allocation2] sm:$0xff]  ;;  %vm129_vm1 = vcmask 130048   ;;  %v219_v4 = vld [vmem:[#allocation7 + $0x78] sm:$0xff]  ;;  %v218_v5 = vld [vmem:[#allocation7 + $0x70] sm:$0xff]  ;;  %s993_s1 = smov [#allocation13]  }
  0x4c   :  { %682 = vmatprep.subr.mxu1 %v991_v0  ;;  %714 = vmatprep.mubr.msk.f32.mxu1 %vm992_vm0, %v991_v0  ;;  %v217_v6 = vld [vmem:[#allocation7 + $0x68] sm:$0xff]  ;;  %v216_v7 = vld [vmem:[#allocation7 + $0x60] sm:$0xff]  ;;  %v215_v8 = vld [vmem:[#allocation7 + $0x58] sm:$0xff]  ;;  %s586_s12 = sshll.u32 %s993_s1, 4  ;;  %s587_s12 = int_to_ptr.vmem [resolvable:$true] %s586_s12 }
  0x4d   :  { %676 = vmatpush3.msra.mxu0 %v121_v1  ;;  %683 = vmatpush3.msra.mxu1 %v219_v4  ;;  %v214_v9 = vld [vmem:[#allocation7 + $0x50] sm:$0xff]  ;;  %v213_v10 = vld [vmem:[#allocation7 + $0x48] sm:$0xff]  ;;  %v212_v11 = vld [vmem:[#allocation7 + $0x40] sm:$0xff]  ;;  %s953_s13 = scalar_lea.vmem %s587_s12, 128  ;;  %p958_p3 = scmp.lt.s32.totalorder %s587_s12, %s587_s12 }
  0x4e   :  { %677 = vmatprep.subr.mxu0 %v991_v0  ;;  %684 = vmatprep.subr.mxu1 %v991_v0  ;;  %v211_v12 = vld [vmem:[#allocation7 + $0x38] sm:$0xff]  ;;  %v210_v13 = vld [vmem:[#allocation7 + $0x30] sm:$0xff]  ;;  %v209_v14 = vld [vmem:[#allocation7 + $0x28] sm:$0xff]  ;;  %p954_p2 = scmp.ne.s32.totalorder %s587_s12, %s953_s13  ;;  %p959_p4 = scmp.lt.s32.totalorder %s953_s13, %s953_s13 }
  0x4f   :  { %678 = vmatpush3.msra.mxu0 %v120_v2  ;;  %685 = vmatpush3.msra.mxu1 %v218_v5  ;;  %v208_v15 = vld [vmem:[#allocation7 + $0x20] sm:$0xff]  ;;  %v207_v16 = vld [vmem:[#allocation7 + $0x18] sm:$0xff]  ;;  %v206_v17 = vld [vmem:[#allocation7 + $0x10] sm:$0xff] }
  0x50   :  { %680 = vmatmul.mubr.msk.f32.vlgmr.msra.gmra.mxu0 %vm129_vm1, %v119_v3  ;;  %686 = vmatprep.subr.mxu1 %v991_v0  ;;  %v205_v18 = vld [vmem:[#allocation7 + $0x8] sm:$0xff]  ;;  %v204_v19 = vld [vmem:[#allocation7] sm:$0xff]  ;;  %v313_v20 = vld [vmem:[#allocation8 + $0x78] sm:$0xff]  ;;  %p960_p5 = por %p959_p4, %p958_p3 }
  0x51   :  { %717 = vmatprep.subr.mxu0 %v991_v0  ;;  %687 = vmatpush3.msra.mxu1 %v217_v6  ;;  %v312_v21 = vld [vmem:[#allocation8 + $0x70] sm:$0xff]  ;;  %v311_v22 = vld [vmem:[#allocation8 + $0x68] sm:$0xff]  ;;  %v310_v23 = vld [vmem:[#allocation8 + $0x60] sm:$0xff] }
  0x52   :  { %749 = vmatprep.mubr.msk.f32.mxu0 %vm992_vm0, %v991_v0  ;;  %688 = vmatprep.subr.mxu1 %v991_v0  ;;  %v309_v24 = vld [vmem:[#allocation8 + $0x58] sm:$0xff]  ;;  %v308_v25 = vld [vmem:[#allocation8 + $0x50] sm:$0xff]  ;;  %v307_v26 = vld [vmem:[#allocation8 + $0x48] sm:$0xff]  ;;  %p961_p6 = pnand %p960_p5, %p954_p2 }
  0x53   :  { %689 = vmatpush3.msra.mxu1 %v216_v7  ;;  %718 = vmatpush3.msra.mxu0 %v313_v20  ;;  %v306_v27 = vld [vmem:[#allocation8 + $0x40] sm:$0xff]  ;;  %v305_v28 = vld [vmem:[#allocation8 + $0x38] sm:$0xff]  ;;  %v304_v29 = vld [vmem:[#allocation8 + $0x30] sm:$0xff] }
  0x54   :  { %690 = vmatprep.subr.mxu1 %v991_v0  ;;  %719 = vmatprep.subr.mxu0 %v991_v0  ;;  %v303_v30 = vld [vmem:[#allocation8 + $0x28] sm:$0xff]  ;;  %v302_v31 = vld [vmem:[#allocation8 + $0x20] sm:$0xff]  ;;  %v301_v32 = vld [vmem:[#allocation8 + $0x18] sm:$0xff] }
  0x55   :  { %691 = vmatpush3.msra.mxu1 %v215_v8  ;;  %720 = vmatpush3.msra.mxu0 %v312_v21  ;;  %v598_v33 = vld [vmem:[%s1189_s6] ss:$0 sm:$0xff]  ;;  %v300_v38 = vld [vmem:[#allocation8 + $0x10] sm:$0xff]  ;;  %v298_v40 = vld [vmem:[#allocation8] sm:$0xff] }
  0x56   :  { %692 = vmatprep.subr.mxu1 %v991_v0  ;;  %721 = vmatprep.subr.mxu0 %v991_v0  ;;  %v299_v39 = vld [vmem:[#allocation8 + $0x8] sm:$0xff]  ;;  %v407_v41 = vld [vmem:[#allocation10 + $0x78] sm:$0xff]  ;;  %v406_v42 = vld [vmem:[#allocation10 + $0x70] sm:$0xff] }
  0x57   :  { %693 = vmatpush3.msra.mxu1 %v214_v9  ;;  %722 = vmatpush3.msra.mxu0 %v311_v22  ;;  %v405_v43 = vld [vmem:[#allocation10 + $0x68] sm:$0xff]  ;;  %v404_v44 = vld [vmem:[#allocation10 + $0x60] sm:$0xff]  ;;  %v403_v45 = vld [vmem:[#allocation10 + $0x58] sm:$0xff] }
  0x58   :  { %694 = vmatprep.subr.mxu1 %v991_v0  ;;  %723 = vmatprep.subr.mxu0 %v991_v0  ;;  %v402_v46 = vld [vmem:[#allocation10 + $0x50] sm:$0xff]  ;;  %v401_v47 = vld [vmem:[#allocation10 + $0x48] sm:$0xff]  ;;  %v400_v48 = vld [vmem:[#allocation10 + $0x40] sm:$0xff] }
  0x59   :  { %695 = vmatpush3.msra.mxu1 %v213_v10  ;;  %724 = vmatpush3.msra.mxu0 %v310_v23  ;;  %v399_v49 = vld [vmem:[#allocation10 + $0x38] sm:$0xff]  ;;  %v398_v50 = vld [vmem:[#allocation10 + $0x30] sm:$0xff]  ;;  %v397_v51 = vld [vmem:[#allocation10 + $0x28] sm:$0xff] }
  0x5a   :  { %696 = vmatprep.subr.mxu1 %v991_v0  ;;  %725 = vmatprep.subr.mxu0 %v991_v0  ;;  %v396_v52 = vld [vmem:[#allocation10 + $0x20] sm:$0xff]  ;;  %v395_v53 = vld [vmem:[#allocation10 + $0x18] sm:$0xff]  ;;  %v600_v54 = vld [vmem:[%s1190_s7] ss:$0 sm:$0xff] }
  0x5b   :  { %697 = vmatpush3.msra.mxu1 %v212_v11  ;;  %726 = vmatpush3.msra.mxu0 %v309_v24  ;;  %v394_v59 = vld [vmem:[#allocation10 + $0x10] sm:$0xff]  ;;  %v393_v60 = vld [vmem:[#allocation10 + $0x8] sm:$0xff]  ;;  %v392_v61 = vld [vmem:[#allocation10] sm:$0xff] }
  0x5c   :  { %698 = vmatprep.subr.mxu1 %v991_v0  ;;  %727 = vmatprep.subr.mxu0 %v991_v0  ;;  %v501_v62 = vld [vmem:[#allocation11 + $0x78] sm:$0xff]  ;;  %v500_v63 = vld [vmem:[#allocation11 + $0x70] sm:$0xff]  ;;  %v499_v1 = vld [vmem:[#allocation11 + $0x68] sm:$0xff] }
  0x5d   :  { %699 = vmatpush3.msra.mxu1 %v211_v12  ;;  %728 = vmatpush3.msra.mxu0 %v308_v25  ;;  %v498_v2 = vld [vmem:[#allocation11 + $0x60] sm:$0xff]  ;;  %v497_v3 = vld [vmem:[#allocation11 + $0x58] sm:$0xff]  ;;  %v496_v4 = vld [vmem:[#allocation11 + $0x50] sm:$0xff] }
  0x5e   :  { %700 = vmatprep.subr.mxu1 %v991_v0  ;;  %729 = vmatprep.subr.mxu0 %v991_v0  ;;  %v495_v5 = vld [vmem:[#allocation11 + $0x48] sm:$0xff]  ;;  %v494_v6 = vld [vmem:[#allocation11 + $0x40] sm:$0xff]  ;;  %v493_v7 = vld [vmem:[#allocation11 + $0x38] sm:$0xff] }
  0x5f   :  { %701 = vmatpush3.msra.mxu1 %v210_v13  ;;  %730 = vmatpush3.msra.mxu0 %v307_v26  ;;  %v492_v8 = vld [vmem:[#allocation11 + $0x30] sm:$0xff]  ;;  %v491_v9 = vld [vmem:[#allocation11 + $0x28] sm:$0xff]  ;;  %v490_v10 = vld [vmem:[#allocation11 + $0x20] sm:$0xff] }
  0x60   :  { %702 = vmatprep.subr.mxu1 %v991_v0  ;;  %731 = vmatprep.subr.mxu0 %v991_v0  ;;  %v489_v11 = vld [vmem:[#allocation11 + $0x18] sm:$0xff]  ;;  %v601_v12 = vld [vmem:[%s1191_s8] ss:$0 sm:$0xff] }
  0x61   :  { %703 = vmatpush3.msra.mxu1 %v209_v14  ;;  %732 = vmatpush3.msra.mxu0 %v306_v27  ;;  %v602_v20 = vld [vmem:[%s1192_s9] ss:$0 sm:$0xff] }
  0x62   :  { %704 = vmatprep.subr.mxu1 %v991_v0  ;;  %733 = vmatprep.subr.mxu0 %v991_v0  ;;  %v603_v25 = vld [vmem:[%s1193_s10] ss:$0 sm:$0xff] }
  0x63   :  { %705 = vmatpush3.msra.mxu1 %v208_v15  ;;  %734 = vmatpush3.msra.mxu0 %v305_v28 }
  0x64   :  { %706 = vmatprep.subr.mxu1 %v991_v0  ;;  %735 = vmatprep.subr.mxu0 %v991_v0 }
  0x65   :  { %707 = vmatpush3.msra.mxu1 %v207_v16  ;;  %736 = vmatpush3.msra.mxu0 %v304_v29 }
  0x66   :  { %708 = vmatprep.subr.mxu1 %v991_v0  ;;  %737 = vmatprep.subr.mxu0 %v991_v0 }
  0x67   :  { %709 = vmatpush3.msra.mxu1 %v206_v17  ;;  %738 = vmatpush3.msra.mxu0 %v303_v30  ;;  %v488_v17 = vld [vmem:[#allocation11 + $0x10] sm:$0xff] }
  0x68   :  { %710 = vmatprep.subr.mxu1 %v991_v0  ;;  %739 = vmatprep.subr.mxu0 %v991_v0 }
  0x69   :  { %711 = vmatpush3.msra.mxu1 %v205_v18  ;;  %740 = vmatpush3.msra.mxu0 %v302_v31  ;;  %v487_v18 = vld [vmem:[#allocation11 + $0x8] sm:$0xff] }
  0x6a   :  { %712 = vmatprep.subr.mxu1 %v991_v0  ;;  %741 = vmatprep.subr.mxu0 %v991_v0 }
  0x6b   :  { %713 = vmatpush3.msra.mxu1 %v204_v19  ;;  %742 = vmatpush3.msra.mxu0 %v301_v32  ;;  %v486_v19 = vld [vmem:[#allocation11] sm:$0xff] }
  0x6c   :  { %752 = vmatprep.subr.mxu1 %v991_v0  ;;  %743 = vmatprep.subr.mxu0 %v991_v0 }
  0x6d   :  { %744 = vmatpush3.msra.mxu0 %v300_v38 }
  0x6e   :  { %745 = vmatprep.subr.mxu0 %v991_v0 }
  0x6f   :  { %746 = vmatpush3.msra.mxu0 %v299_v39 }
  0x70   :  { %747 = vmatprep.subr.mxu0 %v991_v0 }
  0x71   :  { %748 = vmatpush3.msra.mxu0 %v298_v40 }
  0x72   :  { %787 = vmatprep.subr.mxu0 %v991_v0 }
 0x110   :  { %v199_v34 = vpop.f32.mrf.mxu0 }
 0x111   :  { %v200_v35 = vadd.f32 %v598_v33, %v199_v34 }
 0x112   :  { %v681_v36 = vpop.f32.mrf.mxu0 }
 0x113   :  { %v203_v37 = vmax.f32 %v200_v35, 0.0 }
 0x115   :  { %715 = vmatmul.mubr.f32.vlgmr.msra.gmra.mxu1 %v203_v37 }
 0x116   :  { %784 = vmatprep.mubr.msk.f32.mxu1 %vm992_vm0, %v991_v0  ;;  %753 = vmatpush3.msra.mxu1 %v407_v41 }
 0x117   :  { %754 = vmatprep.subr.mxu1 %v991_v0 }
 0x118   :  { %755 = vmatpush3.msra.mxu1 %v406_v42 }
 0x119   :  { %756 = vmatprep.subr.mxu1 %v991_v0 }
 0x11a   :  { %757 = vmatpush3.msra.mxu1 %v405_v43 }
 0x11b   :  { %758 = vmatprep.subr.mxu1 %v991_v0 }
 0x11c   :  { %759 = vmatpush3.msra.mxu1 %v404_v44 }
 0x11d   :  { %760 = vmatprep.subr.mxu1 %v991_v0 }
 0x11e   :  { %761 = vmatpush3.msra.mxu1 %v403_v45 }
 0x11f   :  { %762 = vmatprep.subr.mxu1 %v991_v0 }
 0x120   :  { %763 = vmatpush3.msra.mxu1 %v402_v46 }
 0x121   :  { %764 = vmatprep.subr.mxu1 %v991_v0 }
 0x122   :  { %765 = vmatpush3.msra.mxu1 %v401_v47 }
 0x123   :  { %766 = vmatprep.subr.mxu1 %v991_v0 }
 0x124   :  { %767 = vmatpush3.msra.mxu1 %v400_v48 }
 0x125   :  { %768 = vmatprep.subr.mxu1 %v991_v0 }
 0x126   :  { %769 = vmatpush3.msra.mxu1 %v399_v49 }
 0x127   :  { %770 = vmatprep.subr.mxu1 %v991_v0 }
 0x128   :  { %771 = vmatpush3.msra.mxu1 %v398_v50 }
 0x129   :  { %772 = vmatprep.subr.mxu1 %v991_v0 }
 0x12a   :  { %773 = vmatpush3.msra.mxu1 %v397_v51 }
 0x12b   :  { %774 = vmatprep.subr.mxu1 %v991_v0 }
 0x12c   :  { %775 = vmatpush3.msra.mxu1 %v396_v52 }
 0x12d   :  { %776 = vmatprep.subr.mxu1 %v991_v0 }
 0x12e   :  { %777 = vmatpush3.msra.mxu1 %v395_v53 }
 0x12f   :  { %778 = vmatprep.subr.mxu1 %v991_v0 }
 0x130   :  { %779 = vmatpush3.msra.mxu1 %v394_v59 }
 0x131   :  { %780 = vmatprep.subr.mxu1 %v991_v0 }
 0x132   :  { %781 = vmatpush3.msra.mxu1 %v393_v60 }
 0x133   :  { %782 = vmatprep.subr.mxu1 %v991_v0 }
 0x134   :  { %783 = vmatpush3.msra.mxu1 %v392_v61 }
 0x1d5   :  { %v293_v55 = vpop.f32.mrf.mxu1 }
 0x1d6   :  { %v294_v56 = vadd.f32 %v600_v54, %v293_v55 }
 0x1d7   :  { %v716_v57 = vpop.f32.mrf.mxu1 }
 0x1d8   :  { %v297_v58 = vmax.f32 %v294_v56, 0.0 }
 0x1da   :  { %750 = vmatmul.mubr.f32.vlgmr.msra.gmra.mxu0 %v297_v58 }
 0x1db   :  { %819 = vmatprep.mubr.msk.f32.mxu0 %vm992_vm0, %v991_v0  ;;  %788 = vmatpush3.msra.mxu0 %v501_v62 }
 0x1dc   :  { %789 = vmatprep.subr.mxu0 %v991_v0 }
 0x1dd   :  { %790 = vmatpush3.msra.mxu0 %v500_v63 }
 0x1de   :  { %791 = vmatprep.subr.mxu0 %v991_v0 }
 0x1df   :  { %792 = vmatpush3.msra.mxu0 %v499_v1 }
 0x1e0   :  { %793 = vmatprep.subr.mxu0 %v991_v0 }
 0x1e1   :  { %794 = vmatpush3.msra.mxu0 %v498_v2 }
 0x1e2   :  { %795 = vmatprep.subr.mxu0 %v991_v0 }
 0x1e3   :  { %796 = vmatpush3.msra.mxu0 %v497_v3 }
 0x1e4   :  { %797 = vmatprep.subr.mxu0 %v991_v0 }
 0x1e5   :  { %798 = vmatpush3.msra.mxu0 %v496_v4 }
 0x1e6   :  { %799 = vmatprep.subr.mxu0 %v991_v0 }
 0x1e7   :  { %800 = vmatpush3.msra.mxu0 %v495_v5 }
 0x1e8   :  { %801 = vmatprep.subr.mxu0 %v991_v0 }
 0x1e9   :  { %802 = vmatpush3.msra.mxu0 %v494_v6 }
 0x1ea   :  { %803 = vmatprep.subr.mxu0 %v991_v0 }
 0x1eb   :  { %804 = vmatpush3.msra.mxu0 %v493_v7 }
 0x1ec   :  { %805 = vmatprep.subr.mxu0 %v991_v0 }
 0x1ed   :  { %806 = vmatpush3.msra.mxu0 %v492_v8 }
 0x1ee   :  { %807 = vmatprep.subr.mxu0 %v991_v0 }
 0x1ef   :  { %808 = vmatpush3.msra.mxu0 %v491_v9 }
 0x1f0   :  { %809 = vmatprep.subr.mxu0 %v991_v0 }
 0x1f1   :  { %810 = vmatpush3.msra.mxu0 %v490_v10 }
 0x1f2   :  { %811 = vmatprep.subr.mxu0 %v991_v0 }
 0x1f3   :  { %812 = vmatpush3.msra.mxu0 %v489_v11 }
 0x1f4   :  { %813 = vmatprep.subr.mxu0 %v991_v0 }
 0x1f5   :  { %814 = vmatpush3.msra.mxu0 %v488_v17 }
 0x1f6   :  { %815 = vmatprep.subr.mxu0 %v991_v0 }
 0x1f7   :  { %816 = vmatpush3.msra.mxu0 %v487_v18 }
 0x1f8   :  { %817 = vmatprep.subr.mxu0 %v991_v0 }
 0x1f9   :  { %818 = vmatpush3.msra.mxu0 %v486_v19 }
 0x29a   :  { %v387_v13 = vpop.f32.mrf.mxu0 }
 0x29b   :  { %v388_v14 = vadd.f32 %v601_v12, %v387_v13 }
 0x29c   :  { %v751_v15 = vpop.f32.mrf.mxu0 }
 0x29d   :  { %v391_v16 = vmax.f32 %v388_v14, 0.0 }
 0x29f   :  { %785 = vmatmul.mubr.f32.vlgmr.msra.gmra.mxu1 %v391_v16 }
 0x35f   :  { %v481_v21 = vpop.f32.mrf.mxu1 }
 0x360   :  { %v482_v22 = vadd.f32 %v602_v20, %v481_v21 }
 0x361   :  { %v786_v23 = vpop.f32.mrf.mxu1 }
 0x362   :  { %v485_v24 = vmax.f32 %v482_v22, 0.0 }
 0x364   :  { %820 = vmatmul.mubr.f32.vlgmr.msra.gmra.mxu0 %v485_v24 }
 0x424   :  { %v575_v26 = vpop.f32.mrf.mxu0 }
 0x425   :  { %v576_v27 = vadd.f32 %v603_v25, %v575_v26 }
 0x426   :  { %v821_v0 = vpop.f32.mrf.mxu0 }
 0x427   :  { %579 = vst.msk [vmem:[#allocation13] sm:$0xff] %vm129_vm1, %v576_v27 }
 0x428   :  { %964 = shalt.err (!%p961_p6)
}
 0x429   :  { %589 = dma.vmem_to_hbm [thread:$0]  %s587_s12, 128, %s1194_s11, [#allocation4]  }
 0x42a   :  { %981 = dma.done.wait [#allocation4], 128  }
 0x42b   :  { %982 = vsyncadd [#allocation4], 4294967168 }
 0x42c   :  { %593 = vsyncpa [#allocation3], 1 }
 0x42d   :  { %594 = vsyncpa [#allocation6], 1 }
 0x42e   :  { %595 = vsyncpa [#allocation9], 1 }
 0x42f   :  { %596 = vsyncpa [#allocation12], 1 }
 0x430   :  { %597 = vsyncpa [#allocation4], 1 }

</bundles_post_ra>
